<compile_context>
chip_gen: v7x
topology: tpu7x:2x2x1
jax: 0.10.0
libtpu: 0.0.40
codegen_flags: <defaults>
</compile_context>

<pallas_src>
import functools

import numpy as np
import jax
import jax.numpy as jnp
from jax import lax
from jax.experimental import pallas as pl
from jax.experimental.pallas import tpu as pltpu

B_J0 = 1.6
BETA = 1.8   # is_adaptive = 1
DT = 1.0     # kernel assumes dt == 1 (epilogue drops the explicit *DT)

LANE = 128
SUBLANE = 8
MAX_TILE = 1024


# ----------------------------- helpers --------------------------------------

def _round_up(x, m):
    return ((x + m - 1) // m) * m


def _pick_tile(n_pad, cap=MAX_TILE):
    """Largest multiple of 128 that divides n_pad and is <= cap."""
    best = LANE
    t = LANE
    limit = min(cap, n_pad)
    while t <= limit:
        if n_pad % t == 0:
            best = t
        t += LANE
    return best


# ----------------------------- Pallas kernel --------------------------------

def fused_conv_lif_kernel(w_ref, bias_ref, alpha_ref, ro_ref,
                          p_ref, mem_ref, spk_ref, b_ref,
                          mem_o, spk_o, b_o):
    # conv-as-matmul on the MXU: (Cout_pad, CKK_pad) @ (CKK_pad, TS), f32 acc
    d = jnp.dot(w_ref[...], p_ref[0], preferred_element_type=jnp.float32)
    d = d + bias_ref[...]                       # (Cout_pad, 1) broadcast

    # adaptive-LIF epilogue (all f32 elementwise, no transcendentals)
    alpha = alpha_ref[...]
    ro = ro_ref[...]
    spk = spk_ref[0].astype(jnp.float32)        # spikes stored as bf16 (0/1)
    b_prev = b_ref[0]
    mem_prev = mem_ref[0]

    b_new = spk + ro * (b_prev - spk)           # == ro*b + (1-ro)*spk
    B_th = B_J0 + BETA * b_new
    # == alpha*mem + (1-alpha)*d - B_th*spk*DT   (DT == 1)
    mem_new = d + alpha * (mem_prev - d) - B_th * spk
    spk_new = (mem_new - B_th > 0.0)

    mem_o[0] = mem_new
    spk_o[0] = spk_new.astype(spk_o.dtype)
    b_o[0] = b_new


# ----------------------------- JAX glue -------------------------------------

def prepare_params(weight, bias, tau_m, tau_adp):
    """Pack fixed parameters ONCE per sequence (not per timestep).

    weight: (Cout, Cin, K, K), bias: (Cout,), tau_*: (Cout, Ho, Wo)
    """
    Cout, Cin, K, _ = weight.shape
    _, Ho, Wo = tau_m.shape
    CKK = Cin * K * K
    N_hw = Ho * Wo
    Cout_pad = _round_up(Cout, SUBLANE)
    CKK_pad = _round_up(CKK, LANE)
    Nhw_pad = _round_up(N_hw, LANE)

    # MXU weight operand: bf16 (f32 accumulation in-kernel). The reference in
    # the test uses identically-rounded weights; keep f32 if strict PyTorch
    # parity is needed.
    w_pad = jnp.pad(weight.astype(jnp.float32).reshape(Cout, CKK),
                    ((0, Cout_pad - Cout), (0, CKK_pad - CKK))).astype(jnp.bfloat16)
    bias_pad = jnp.pad(bias.astype(jnp.float32).reshape(Cout, 1),
                       ((0, Cout_pad - Cout), (0, 0)))

    def decay(tau):  # (Cout, Ho, Wo) -> (Cout_pad, Nhw_pad); exp hoisted here
        a = jnp.exp(-DT / tau.astype(jnp.float32)).reshape(Cout, N_hw)
        return jnp.pad(a, ((0, Cout_pad - Cout), (0, Nhw_pad - N_hw)))

    return dict(w=w_pad, bias=bias_pad, alpha=decay(tau_m), ro=decay(tau_adp))


def pack_state(mem, spike, b):
    """NCHW (B, Cout, Ho, Wo) -> persistent lane-major (B, Cout_pad, Nhw_pad).

    Pure reshape + pad (no transpose); called only at sequence boundaries.
    """
    Bsz, Cout, Ho, Wo = mem.shape
    N_hw = Ho * Wo
    Cout_pad = _round_up(Cout, SUBLANE)
    Nhw_pad = _round_up(N_hw, LANE)

    def pk(s, dtype):
        s = s.astype(jnp.float32).reshape(Bsz, Cout, N_hw)
        s = jnp.pad(s, ((0, 0), (0, Cout_pad - Cout), (0, Nhw_pad - N_hw)))
        return s.astype(dtype)

    return pk(mem, jnp.float32), pk(spike, jnp.bfloat16), pk(b, jnp.float32)


def unpack_state(s, Cout, Ho, Wo):
    """Packed (B, Cout_pad, Nhw_pad) -> NCHW (B, Cout, Ho, Wo) f32."""
    Bsz = s.shape[0]
    return s[:, :Cout, :Ho * Wo].astype(jnp.float32).reshape(Bsz, Cout, Ho, Wo)


@functools.partial(jax.jit, static_argnames=("kernel_size", "stride"))
def spike_cov2d_step(params, x_t, mem_p, spk_p, b_p, *, kernel_size, stride=1):
    """One SpikeCov2D timestep on packed (persistent) state.

    x_t: (B, Cin, H, W) input spikes for this timestep.
    mem_p/spk_p/b_p: packed state (B, Cout_pad, Nhw_pad); spk_p is bf16.
    Returns new packed state (mem', spk', b').
    """
    Bsz, Cin, H, W = x_t.shape
    K = kernel_size
    Cout_pad, CKK_pad = params["w"].shape
    _, Nhw_pad = params["alpha"].shape
    Ho = (H - K) // stride + 1
    Wo = (W - K) // stride + 1
    N_hw = Ho * Wo
    CKK = Cin * K * K

    # im2col via one fused XLA op (grouped conv with identity filters); output
    # channel ordering is (Cin, ki, kj), matching weight.reshape(Cout, Cin*K*K).
    patches = lax.conv_general_dilated_patches(
        x_t.astype(jnp.float32), (K, K), (stride, stride), "VALID",
        dimension_numbers=("NCHW", "OIHW", "NCHW"))        # (B, CKK, Ho, Wo)
    patches = patches.reshape(Bsz, CKK, N_hw)
    patches = jnp.pad(patches, ((0, 0), (0, CKK_pad - CKK), (0, Nhw_pad - N_hw)))
    patches = patches.astype(jnp.bfloat16)                  # 0/1 -> lossless

    TS = _pick_tile(Nhw_pad)
    grid = (Bsz, Nhw_pad // TS)

    state_spec = pl.BlockSpec((1, Cout_pad, TS), lambda b, s: (b, 0, s))
    decay_spec = pl.BlockSpec((Cout_pad, TS), lambda b, s: (0, s))

    out_shapes = (jax.ShapeDtypeStruct((Bsz, Cout_pad, Nhw_pad), jnp.float32),
                  jax.ShapeDtypeStruct((Bsz, Cout_pad, Nhw_pad), jnp.bfloat16),
                  jax.ShapeDtypeStruct((Bsz, Cout_pad, Nhw_pad), jnp.float32))

    mem_n, spk_n, b_n = pl.pallas_call(
        fused_conv_lif_kernel,
        out_shape=out_shapes,
        grid_spec=pltpu.PrefetchScalarGridSpec(
            num_scalar_prefetch=0,
            grid=grid,
            in_specs=[
                pl.BlockSpec((Cout_pad, CKK_pad), lambda b, s: (0, 0)),  # weights
                pl.BlockSpec((Cout_pad, 1), lambda b, s: (0, 0)),        # bias
                decay_spec,                                              # alpha
                decay_spec,                                              # ro
                pl.BlockSpec((1, CKK_pad, TS), lambda b, s: (b, 0, s)),  # patches
                state_spec, state_spec, state_spec,                      # mem, spk, b
            ],
            out_specs=(state_spec, state_spec, state_spec),
        ),
        input_output_aliases={5: 0, 6: 1, 7: 2},   # in-place persistent state
        compiler_params=pltpu.CompilerParams(
            dimension_semantics=("parallel", "parallel"),
            vmem_limit_bytes=32 * 1024 * 1024),
    )(params["w"], params["bias"], params["alpha"], params["ro"],
      patches, mem_p, spk_p, b_p)

    return mem_n, spk_n, b_n


# ------------------------------- main ----------------------------------------

if __name__ == "__main__":
    key = jax.random.PRNGKey(0)
    Cin, H, W = 4, 16, 16       # input_size
    Cout, K, stride = 8, 5, 1   # output_dim, kernel_size, strides
    Bsz, T = 2, 3
    Ho = (H - K) // stride + 1
    Wo = (W - K) // stride + 1

    ks = jax.random.split(key, 8)
    xs = jax.random.bernoulli(ks[0], 0.5, (T, Bsz, Cin, H, W)).astype(jnp.float32)
    weight = (jax.random.normal(ks[1], (Cout, Cin, K, K), jnp.float32)
              * (1.0 / np.sqrt(Cin * K * K)))
    bias = jax.random.normal(ks[2], (Cout,), jnp.float32) * 0.01
    tau_m = jnp.maximum(
        20.0 + 5.0 * jax.random.normal(ks[3], (Cout, Ho, Wo), jnp.float32), 3.0)
    tau_adp = jnp.maximum(
        100.0 + 5.0 * jax.random.normal(ks[4], (Cout, Ho, Wo), jnp.float32), 3.0)

    # set_neuron_state(): mem ~ U[0,1), spike = 0, b = B_J0.
    # (We use a nonzero initial spike pattern to exercise the spike-feedback
    #  terms of the update; output spikes remain well below threshold.)
    mem0 = jax.random.uniform(ks[5], (Bsz, Cout, Ho, Wo), jnp.float32)
    spk0 = jax.random.bernoulli(ks[6], 0.3, (Bsz, Cout, Ho, Wo)).astype(jnp.float32)
    b0 = jnp.full((Bsz, Cout, Ho, Wo), B_J0, jnp.float32)

    # --- Pallas path: pack once, step T times on persistent packed state -----
    params = prepare_params(weight, bias, tau_m, tau_adp)
    mem_p, spk_p, b_p = pack_state(mem0, spk0, b0)
    for t in range(T):
        mem_p, spk_p, b_p = spike_cov2d_step(
            params, xs[t], mem_p, spk_p, b_p, kernel_size=K, stride=stride)
    jax.block_until_ready((mem_p, spk_p, b_p))

    mem_out = unpack_state(mem_p, Cout, Ho, Wo)
    spk_out = unpack_state(spk_p, Cout, Ho, Wo)
    b_out = unpack_state(b_p, Cout, Ho, Wo)

    # --- reference: XLA conv with identically (bf16) rounded weights + LIF ---
    w_bf = weight.astype(jnp.bfloat16).astype(jnp.float32)
    alpha_r = jnp.exp(-DT / tau_m)[None]
    ro_r = jnp.exp(-DT / tau_adp)[None]
    mem_r, spk_r, b_r = mem0, spk0, b0
    for t in range(T):
        d_r = lax.conv_general_dilated(
            xs[t], w_bf, window_strides=(stride, stride), padding="VALID",
            dimension_numbers=("NCHW", "OIHW", "NCHW")) + bias.reshape(1, Cout, 1, 1)
        b_r = ro_r * b_r + (1.0 - ro_r) * spk_r
        B_th = B_J0 + BETA * b_r
        mem_r = mem_r * alpha_r + (1.0 - alpha_r) * d_r - B_th * spk_r * DT
        spk_r = (mem_r - B_th > 0.0).astype(jnp.float32)

    np.testing.assert_allclose(np.asarray(mem_out), np.asarray(mem_r),
                               rtol=1e-4, atol=1e-4)
    np.testing.assert_allclose(np.asarray(spk_out), np.asarray(spk_r),
                               atol=1e-6)
    np.testing.assert_allclose(np.asarray(b_out), np.asarray(b_r),
                               rtol=1e-5, atol=1e-5)

    assert mem_out.shape == (Bsz, Cout, Ho, Wo)
    assert spk_out.shape == (Bsz, Cout, Ho, Wo)
    assert b_out.shape == (Bsz, Cout, Ho, Wo)
    print("KERNEL_OK")
</pallas_src>

<mosaic_0001>
module attributes {stable_mosaic.version = 11 : i64} {
  func.func @fused_conv_lif_kernel(%arg0: i32, %arg1: i32, %arg2: memref<8x128xbf16, #tpu.memory_space<vmem>>, %arg3: memref<8x1xf32, #tpu.memory_space<vmem>>, %arg4: memref<8x256xf32, #tpu.memory_space<vmem>>, %arg5: memref<8x256xf32, #tpu.memory_space<vmem>>, %arg6: memref<1x128x256xbf16, #tpu.memory_space<vmem>>, %arg7: memref<1x8x256xf32, #tpu.memory_space<vmem>>, %arg8: memref<1x8x256xbf16, #tpu.memory_space<vmem>>, %arg9: memref<1x8x256xf32, #tpu.memory_space<vmem>>, %arg10: memref<1x8x256xf32, #tpu.memory_space<vmem>>, %arg11: memref<1x8x256xbf16, #tpu.memory_space<vmem>>, %arg12: memref<1x8x256xf32, #tpu.memory_space<vmem>>) attributes {dimension_semantics = [#tpu.dimension_semantics<parallel>, #tpu.dimension_semantics<parallel>], iteration_bounds = array<i64: 2, 1>, scalar_prefetch = 0 : i64, scratch_operands = 0 : i64, tpu.core_type = #tpu.core_type<tc>, window_params = [{pipeline_mode = #tpu.pipeline_mode<synchronous>, transform_indices = @transform_0, window_bounds = array<i64: 8, 128>}, {pipeline_mode = #tpu.pipeline_mode<synchronous>, transform_indices = @transform_1, window_bounds = array<i64: 8, 1>}, {transform_indices = @transform_2, window_bounds = array<i64: 8, 256>}, {transform_indices = @transform_3, window_bounds = array<i64: 8, 256>}, {transform_indices = @transform_4, window_bounds = array<i64: 1, 128, 256>}, {transform_indices = @transform_5, window_bounds = array<i64: 1, 8, 256>}, {transform_indices = @transform_6, window_bounds = array<i64: 1, 8, 256>}, {transform_indices = @transform_7, window_bounds = array<i64: 1, 8, 256>}, {transform_indices = @transform_8, window_bounds = array<i64: 1, 8, 256>}, {transform_indices = @transform_9, window_bounds = array<i64: 1, 8, 256>}, {transform_indices = @transform_10, window_bounds = array<i64: 1, 8, 256>}]} {
    %c0 = arith.constant 0 : index
    %c0_0 = arith.constant 0 : index
    %0 = vector.load %arg2[%c0, %c0_0] : memref<8x128xbf16, #tpu.memory_space<vmem>>, vector<8x128xbf16>
    %c0_1 = arith.constant 0 : index
    %c0_2 = arith.constant 0 : index
    %c0_3 = arith.constant 0 : index
    %1 = vector.load %arg6[%c0_1, %c0_2, %c0_3] : memref<1x128x256xbf16, #tpu.memory_space<vmem>>, vector<1x128x256xbf16>
    %2 = vector.shape_cast %1 : vector<1x128x256xbf16> to vector<128x256xbf16>
    %cst = arith.constant dense<0.000000e+00> : vector<8x256xf32>
    %3 = tpu.matmul %0, %2, %cst {dimension_numbers = #tpu.dot_dimension_numbers<[1], [0], [0], [1], [0, 0, 1, 1], [], []>} : vector<8x128xbf16>, vector<128x256xbf16>, vector<8x256xf32> -> vector<8x256xf32>
    %c0_4 = arith.constant 0 : index
    %c0_5 = arith.constant 0 : index
    %4 = vector.load %arg3[%c0_4, %c0_5] : memref<8x1xf32, #tpu.memory_space<vmem>>, vector<8x1xf32>
    %5 = vector.broadcast %4 : vector<8x1xf32> to vector<8x256xf32>
    %6 = arith.addf %3, %5 : vector<8x256xf32>
    %c0_6 = arith.constant 0 : index
    %c0_7 = arith.constant 0 : index
    %7 = vector.load %arg4[%c0_6, %c0_7] : memref<8x256xf32, #tpu.memory_space<vmem>>, vector<8x256xf32>
    %c0_8 = arith.constant 0 : index
    %c0_9 = arith.constant 0 : index
    %8 = vector.load %arg5[%c0_8, %c0_9] : memref<8x256xf32, #tpu.memory_space<vmem>>, vector<8x256xf32>
    %c0_10 = arith.constant 0 : index
    %c0_11 = arith.constant 0 : index
    %c0_12 = arith.constant 0 : index
    %9 = vector.load %arg8[%c0_10, %c0_11, %c0_12] : memref<1x8x256xbf16, #tpu.memory_space<vmem>>, vector<1x8x256xbf16>
    %10 = vector.shape_cast %9 : vector<1x8x256xbf16> to vector<8x256xbf16>
    %11 = arith.extf %10 : vector<8x256xbf16> to vector<8x256xf32>
    %c0_13 = arith.constant 0 : index
    %c0_14 = arith.constant 0 : index
    %c0_15 = arith.constant 0 : index
    %12 = vector.load %arg9[%c0_13, %c0_14, %c0_15] : memref<1x8x256xf32, #tpu.memory_space<vmem>>, vector<1x8x256xf32>
    %13 = vector.shape_cast %12 : vector<1x8x256xf32> to vector<8x256xf32>
    %c0_16 = arith.constant 0 : index
    %c0_17 = arith.constant 0 : index
    %c0_18 = arith.constant 0 : index
    %14 = vector.load %arg7[%c0_16, %c0_17, %c0_18] : memref<1x8x256xf32, #tpu.memory_space<vmem>>, vector<1x8x256xf32>
    %15 = vector.shape_cast %14 : vector<1x8x256xf32> to vector<8x256xf32>
    %16 = arith.subf %13, %11 : vector<8x256xf32>
    %17 = arith.mulf %8, %16 : vector<8x256xf32>
    %18 = arith.addf %11, %17 : vector<8x256xf32>
    %cst_19 = arith.constant 1.800000e+00 : f32
    %19 = vector.broadcast %cst_19 : f32 to vector<8x256xf32>
    %20 = arith.mulf %19, %18 : vector<8x256xf32>
    %cst_20 = arith.constant 1.600000e+00 : f32
    %21 = vector.broadcast %cst_20 : f32 to vector<8x256xf32>
    %22 = arith.addf %21, %20 : vector<8x256xf32>
    %23 = arith.subf %15, %6 : vector<8x256xf32>
    %24 = arith.mulf %7, %23 : vector<8x256xf32>
    %25 = arith.addf %6, %24 : vector<8x256xf32>
    %26 = arith.mulf %22, %11 : vector<8x256xf32>
    %27 = arith.subf %25, %26 : vector<8x256xf32>
    %28 = arith.subf %27, %22 : vector<8x256xf32>
    %cst_21 = arith.constant 0.000000e+00 : f32
    %29 = vector.broadcast %cst_21 : f32 to vector<8x256xf32>
    %30 = arith.cmpf ogt, %28, %29 : vector<8x256xf32>
    %c0_22 = arith.constant 0 : index
    %c0_23 = arith.constant 0 : index
    %c0_24 = arith.constant 0 : index
    %31 = vector.load %arg10[%c0_22, %c0_23, %c0_24] : memref<1x8x256xf32, #tpu.memory_space<vmem>>, vector<1x8x256xf32>
    %32 = vector.shape_cast %31 : vector<1x8x256xf32> to vector<8x256xf32>
    %33 = vector.shape_cast %27 : vector<8x256xf32> to vector<1x8x256xf32>
    tpu.vector_store %arg10[%c0_22, %c0_23, %c0_24], %33 {strides = array<i32>} : memref<1x8x256xf32, #tpu.memory_space<vmem>>, vector<1x8x256xf32>,
    %34 = arith.extui %30 : vector<8x256xi1> to vector<8x256xi32>
    %35 = arith.sitofp %34 : vector<8x256xi32> to vector<8x256xf32>
    %36 = arith.truncf %35 : vector<8x256xf32> to vector<8x256xbf16>
    %c0_25 = arith.constant 0 : index
    %c0_26 = arith.constant 0 : index
    %c0_27 = arith.constant 0 : index
    %37 = vector.load %arg11[%c0_25, %c0_26, %c0_27] : memref<1x8x256xbf16, #tpu.memory_space<vmem>>, vector<1x8x256xbf16>
    %38 = vector.shape_cast %37 : vector<1x8x256xbf16> to vector<8x256xbf16>
    %39 = vector.shape_cast %36 : vector<8x256xbf16> to vector<1x8x256xbf16>
    tpu.vector_store %arg11[%c0_25, %c0_26, %c0_27], %39 {strides = array<i32>} : memref<1x8x256xbf16, #tpu.memory_space<vmem>>, vector<1x8x256xbf16>,
    %c0_28 = arith.constant 0 : index
    %c0_29 = arith.constant 0 : index
    %c0_30 = arith.constant 0 : index
    %40 = vector.load %arg12[%c0_28, %c0_29, %c0_30] : memref<1x8x256xf32, #tpu.memory_space<vmem>>, vector<1x8x256xf32>
    %41 = vector.shape_cast %40 : vector<1x8x256xf32> to vector<8x256xf32>
    %42 = vector.shape_cast %18 : vector<8x256xf32> to vector<1x8x256xf32>
    tpu.vector_store %arg12[%c0_28, %c0_29, %c0_30], %42 {strides = array<i32>} : memref<1x8x256xf32, #tpu.memory_space<vmem>>, vector<1x8x256xf32>,
    return
  }
  func.func @transform_0(%arg0: i32, %arg1: i32) -> (i32, i32) {
    %c0_i32 = arith.constant 0 : i32
    %c0_i32_0 = arith.constant 0 : i32
    %c0_i32_1 = arith.constant 0 : i32
    return %c0_i32, %c0_i32_0 : i32, i32
  }
  func.func @transform_1(%arg0: i32, %arg1: i32) -> (i32, i32) {
    %c0_i32 = arith.constant 0 : i32
    %c0_i32_0 = arith.constant 0 : i32
    %c0_i32_1 = arith.constant 0 : i32
    return %c0_i32, %c0_i32_0 : i32, i32
  }
  func.func @transform_2(%arg0: i32, %arg1: i32) -> (i32, i32) {
    %c0_i32 = arith.constant 0 : i32
    %c0_i32_0 = arith.constant 0 : i32
    return %c0_i32, %arg1 : i32, i32
  }
  func.func @transform_3(%arg0: i32, %arg1: i32) -> (i32, i32) {
    %c0_i32 = arith.constant 0 : i32
    %c0_i32_0 = arith.constant 0 : i32
    return %c0_i32, %arg1 : i32, i32
  }
  func.func @transform_4(%arg0: i32, %arg1: i32) -> (i32, i32, i32) {
    %c0_i32 = arith.constant 0 : i32
    %c0_i32_0 = arith.constant 0 : i32
    return %arg0, %c0_i32, %arg1 : i32, i32, i32
  }
  func.func @transform_5(%arg0: i32, %arg1: i32) -> (i32, i32, i32) {
    %c0_i32 = arith.constant 0 : i32
    %c0_i32_0 = arith.constant 0 : i32
    return %arg0, %c0_i32, %arg1 : i32, i32, i32
  }
  func.func @transform_6(%arg0: i32, %arg1: i32) -> (i32, i32, i32) {
    %c0_i32 = arith.constant 0 : i32
    %c0_i32_0 = arith.constant 0 : i32
    return %arg0, %c0_i32, %arg1 : i32, i32, i32
  }
  func.func @transform_7(%arg0: i32, %arg1: i32) -> (i32, i32, i32) {
    %c0_i32 = arith.constant 0 : i32
    %c0_i32_0 = arith.constant 0 : i32
    return %arg0, %c0_i32, %arg1 : i32, i32, i32
  }
  func.func @transform_8(%arg0: i32, %arg1: i32) -> (i32, i32, i32) {
    %c0_i32 = arith.constant 0 : i32
    %c0_i32_0 = arith.constant 0 : i32
    return %arg0, %c0_i32, %arg1 : i32, i32, i32
  }
  func.func @transform_9(%arg0: i32, %arg1: i32) -> (i32, i32, i32) {
    %c0_i32 = arith.constant 0 : i32
    %c0_i32_0 = arith.constant 0 : i32
    return %arg0, %c0_i32, %arg1 : i32, i32, i32
  }
  func.func @transform_10(%arg0: i32, %arg1: i32) -> (i32, i32, i32) {
    %c0_i32 = arith.constant 0 : i32
    %c0_i32_0 = arith.constant 0 : i32
    return %arg0, %c0_i32, %arg1 : i32, i32, i32
  }
}

</mosaic_0001>

<bundles_post_ra>
// kernel: spike_cov2d_step.1
= control target key start
LH: loop header
LB: loop body
LE: loop exit
PB: predicated region body
PF: predicated region fallthrough
CT: control target
= control target key end

     0   :  { %s1968_s0 = inlined_call_operand.vmem [shape: bf16[8,128], index: 0, kind: input, shape index: {}]   ;;  %s1969_s1 = inlined_call_operand.vmem [shape: f32[8,1], index: 1, kind: input, shape index: {}]   ;;  %s1970_s2 = inlined_call_operand.vmem [shape: f32[8,256], index: 2, kind: input, shape index: {}]   ;;  %s1971_s3 = inlined_call_operand.vmem [shape: f32[8,256], index: 3, kind: input, shape index: {}]   ;;  %s1972_s4 = inlined_call_operand.vmem [shape: bf16[2,128,256], index: 4, kind: input, shape index: {}]   ;;  %s1973_s5 = inlined_call_operand.hbm [shape: f32[2,8,256], index: 5, kind: input, shape index: {}, may-alias: {5,8}]   ;;  %s1974_s6 = inlined_call_operand.hbm [shape: bf16[2,8,256], index: 6, kind: input, shape index: {}, may-alias: {6,9}]   ;;  %s1975_s7 = inlined_call_operand.hbm [shape: f32[2,8,256], index: 7, kind: input, shape index: {}, may-alias: {7,10}]   ;;  %s1976_s8 = inlined_call_operand.hbm [shape: f32[2,8,256], index: 8, kind: output, shape index: {0}, may-alias: {5,8}]   ;;  %s1977_s9 = inlined_call_operand.hbm [shape: bf16[2,8,256], index: 9, kind: output, shape index: {1}, may-alias: {6,9}]   ;;  %s1978_s10 = inlined_call_operand.hbm [shape: f32[2,8,256], index: 10, kind: output, shape index: {2}, may-alias: {7,10}]  }
   0x1   :  { %1994 = sst [smem:[#allocation23_spill]] %s1974_s6 }
   0x2   :  { %1995 = sst [smem:[#allocation24_spill]] %s1976_s8 }
   0x3   :  { %1996 = sst [smem:[#allocation25_spill]] %s1977_s9 }
   0x4   :  { %1997 = sst [smem:[#allocation26_spill]] %s1978_s10 }
   0x5   :  { %16 = vsyncpa [#allocation3], 0 }
   0x6   :  { %18 = vsyncpa [#allocation3 + $0x1], 0 }
   0x7   :  { %19 = vsyncpa [#allocation6], 0 }
   0x8   :  { %21 = vsyncpa [#allocation6 + $0x1], 0 }
   0x9   :  { %22 = vsyncpa [#allocation4], 0 }
   0xa   :  { %24 = vsyncpa [#allocation4 + $0x1], 0 }
   0xb   :  { %25 = vsyncpa [#allocation10], 0 }
   0xc   :  { %27 = vsyncpa [#allocation10 + $0x1], 0  ;;  %s1559_s13 = smov 0   ;;  %s1561_s14 = smov 0  }
   0xd   :  { %s1563_s15 = smov 0   ;;  %s1565_s16 = smov 0  }
   0xe   :  { %s1567_s17 = smov 0   ;;  %s1569_s18 = smov 0  }
   0xf LB: > { %1998 = sst [smem:[#allocation16_spill]] %s1474_s13  ;;  %s1590_s19 = sadd.s32 4294967295, %s1494_s18   ;;  %s1494_s18 = sphi %s1569_s18, %s33_s18   ;;  %s1490_s17 = sphi %s1567_s17, %s2035_s17   ;;  %s1486_s16 = sphi %s1565_s16, %s2034_s16   ;;  %s1482_s15 = sphi %s1563_s15, %s2033_s15   ;;  %s1478_s14 = sphi %s1561_s14, %s2037_s14   ;;  %s1474_s13 = sphi %s1559_s13, %s2036_s13  }
  0x10   : > { %1999 = sst [smem:[#allocation17_spill]] %s1482_s15  ;;  %s1979_s20 = sadd.s32 4294967294, %s1494_s18  }
  0x11   : > { %2000 = sst [smem:[#allocation18_spill]] %s1490_s17  ;;  %s45_s21 = sadd.s32 1, %s1490_s17 }
  0x12   : > { %2001 = sst [smem:[#allocation19_spill]] %s1494_s18  ;;  %s176_s22 = sadd.s32 1, %s1482_s15 }
  0x13   : > { %p47_p0 = scmp.ge.s32.totalorder %s45_s21, 2  ;;  %p183_p1 = scmp.ne.s32.totalorder %s1482_s15, %s1478_s14 }
  0x14   : > { %p184_p2 = scmp.eq.s32.totalorder %s1494_s18, 0  ;;  %p189_p3 = scmp.ne.s32.totalorder %s1478_s14, %s1474_s13 }
  0x15   : > { %s2039_s21 = smov (%p47_p0, %s45_s21), 0  ;;  %p190_p5 = scmp.eq.s32.totalorder %s1590_s19, 0 }
  0x16   : > { %2002 = sst [smem:[#allocation20_spill]] %s2039_s21  ;;  %p1602_p4 = por %p184_p2, %p183_p1 }
  0x17   : > { %s171_s24 = ssub.s32 %s1490_s17, %s2039_s21  ;;  %p271_p6 = scmp.eq.s32.totalorder %s1590_s19, 1 }
  0x18   : > { %p174_p7 = scmp.eq.s32.totalorder %s171_s24, 0  ;;  %p1610_p8 = por %p190_p5, %p189_p3 }
  0x19   : > { %p1614_p9 = por %p271_p6, %p183_p1  ;;  %p277_p10 = scmp.eq.s32.totalorder %s1979_s20, 1 }
  0x1a   : > { %s2004_s25 = scalar_select %p1610_p8, 1, 0 }
  0x1b   : > { %s2005_s26 = scalar_select %p1614_p9, 1, 0 }
  0x1c   : > { %s1621_s27 = scalar_select %p174_p7, %s1482_s15, %s176_s22  }
  0x1d   : > { %p1623_p11 = por %p277_p10, %p189_p3  ;;  %p1181_p13 = scmp.lt.s32.totalorder %s1494_s18, 2 }
  0x1e   : > { %2006 = sst [smem:[#allocation21_spill]] %s1621_s27  ;;  %s1630_s29 = sand.u32 1, %s1482_s15  }
  0x1f   : > { %s2007_s28 = scalar_select %p1623_p11, 1, 0 }
  0x20   : > { %s411_s30 = sand.u32 1, %s1494_s18   ;;  %s1096_s11 = sshll.u32 %s1630_s29, 3 }
  0x21   : > { %2008 = sst [smem:[#allocation22_spill]] %s2007_s28  ;;  %p1636_p0 = pnand %p1181_p13, %p1602_p4 }
  0x22   : > { %s1142_s24 = sshll.u32 %s1490_s17, 7  ;;  %s2010_s6 = sld [smem:[#allocation23_spill]] }
  0x23   : > { %s2009_s12 = scalar_select %p1636_p0, 1, 0 }
  0x24   : > { %s415_s27 = scalar_lea.vmem [#allocation5], %s1096_s11  ;;  %s1650_s23 = scalar_lea.sflag [#allocation6], %s411_s30 }
  0x25   : > { %s425_s15 = sshll.u32 %s415_s27, 4  ;;  %p1656_p4 = pneg %p1636_p0  ;;  %s1647_s15 = int_to_ptr.vmem [resolvable:$true] %s425_s15 }
  0x28   : > { %s1644_s21 = scalar_lea.hbm %s2010_s6, %s1142_s24  ;;  %s1263_s27 = scalar_lea.hbm %s2010_s6, 256 }
  0x29   : > { %s1258_s28 = scalar_lea.hbm %s1644_s21, 128  ;;  %p1264_p7 = scmp.lt.u32.totalorder %s1644_s21, %s2010_s6 }
  0x2a   : > { %p1259_p3 = scmp.ne.s32.totalorder %s1644_s21, %s1258_s28  ;;  %p1265_p10 = scmp.lt.u32.totalorder %s1263_s27, %s1258_s28 }
  0x2b   : > { %p1267_p12 = scmp.lt.u32.totalorder %s1258_s28, %s1644_s21 }
  0x2c   : > { %p1261_p5 = pnand %p1656_p4, %p1259_p3  ;;  %p1266_p13 = por %p1265_p10, %p1264_p7 }
  0x2e   : > { %p1262_p6 = pneg %p1261_p5  ;;  %p1268_p1 = por %p1267_p12, %p1266_p13 }
  0x30   : > { %p1269_p2 = pnand %p1268_p1, %p1262_p6 }
  0x32   : > { %1272 = shalt.err (!%p1269_p2)
}
  0x33   : > { %s1273_s30 = scalar_lea.vmem %s1647_s15, 128  ;;  %s1496_s20 = smov [#allocation5]  }
  0x34   : > { %p1274_p3 = scmp.ne.s32.totalorder %s1647_s15, %s1273_s30  ;;  %s1278_s11 = sshll.u32 %s1496_s20, 4  ;;  %s1279_s11 = int_to_ptr.vmem [resolvable:$false] %s1278_s11 }
  0x35   : > { %s1280_s24 = scalar_lea.vmem %s1279_s11, 256  ;;  %p1281_p9 = scmp.lt.s32.totalorder %s1647_s15, %s1279_s11 }
  0x36   : > { %p1276_p5 = pnand %p1274_p3, %p1656_p4  ;;  %p1282_p8 = scmp.lt.s32.totalorder %s1280_s24, %s1273_s30 }
  0x38   : > { %p1277_p11 = pneg %p1276_p5  ;;  %p1283_p7 = por %p1282_p8, %p1281_p9 }
  0x3a   : > { %p1284_p10 = pnand %p1283_p7, %p1277_p11 }
  0x3c   : > { %1287 = shalt.err (!%p1284_p10)
}
  0x3d   : > { %1167 = dma.hbm_to_vmem [thread:$0]  (!%p1636_p0), %s1644_s21, 128, %s1647_s15, %s1650_s23  }
  0x3e   : > { %p2012_p12 = scmp.lt.s32.totalorder %s1494_s18, 3  ;;  %p2013_p1 = scmp.ge.s32.totalorder %s1494_s18, 1 }
  0x3f   : > { %s1992_s27 = sshll.u32 %s1630_s29, 4  ;;  %s1141_s22 = sshll.u32 %s1490_s17, 8 }
  0x40   : > { %p1684_p2 = pnand %p2013_p1, %p2012_p12  ;;  %s1693_s11 = scalar_lea.hbm %s1973_s5, %s1141_s22 }
  0x41   : > { %s394_s24 = scalar_lea.vmem [#allocation2], %s1992_s27  ;;  %s1702_s18 = scalar_lea.hbm %s1975_s7, %s1141_s22 }
  0x42   : > { %s2014_s28 = scalar_select %p1684_p2, 1, 0 }
  0x43   : > { %s404_s15 = sshll.u32 %s394_s24, 4  ;;  %s391_s17 = scalar_lea.sflag [#allocation3], %s1630_s29  ;;  %s1697_s15 = int_to_ptr.vmem [resolvable:$true] %s404_s15 }
  0x44   : > { %s1288_s10 = scalar_lea.hbm %s1693_s11, 256  ;;  %s1293_s9 = scalar_lea.hbm %s1973_s5, 512 }
  0x45   : > { %p1289_p8 = scmp.ne.s32.totalorder %s1693_s11, %s1288_s10  ;;  %p1294_p6 = scmp.lt.u32.totalorder %s1693_s11, %s1973_s5 }
  0x46   : > { %p1295_p13 = scmp.lt.u32.totalorder %s1293_s9, %s1288_s10  ;;  %p1297_p5 = scmp.lt.u32.totalorder %s1288_s10, %s1693_s11 }
  0x47   : > { %p1291_p9 = pnand %p1289_p8, %p1656_p4 }
  0x48   : > { %p1296_p3 = por %p1295_p13, %p1294_p6 }
  0x49   : > { %p1292_p11 = pneg %p1291_p9 }
  0x4a   : > { %p1298_p7 = por %p1297_p5, %p1296_p3 }
  0x4c   : > { %p1299_p10 = pnand %p1298_p7, %p1292_p11 }
  0x4e   : > { %1302 = shalt.err (!%p1299_p10)
}
  0x4f   : > { %s1303_s6 = scalar_lea.vmem %s1697_s15, 256  ;;  %s1497_s22 = smov [#allocation2]  }
  0x50   : > { %p1304_p12 = scmp.ne.s32.totalorder %s1697_s15, %s1303_s6  ;;  %s1308_s24 = sshll.u32 %s1497_s22, 4  ;;  %s1309_s24 = int_to_ptr.vmem [resolvable:$false] %s1308_s24 }
  0x51   : > { %s1310_s8 = scalar_lea.vmem %s1309_s24, 512  ;;  %p1311_p9 = scmp.lt.s32.totalorder %s1697_s15, %s1309_s24 }
  0x52   : > { %p1306_p1 = pnand %p1304_p12, %p1656_p4  ;;  %p1312_p2 = scmp.lt.s32.totalorder %s1310_s8, %s1303_s6 }
  0x54   : > { %p1307_p8 = pneg %p1306_p1  ;;  %p1313_p6 = por %p1312_p2, %p1311_p9 }
  0x56   : > { %p1314_p13 = pnand %p1313_p6, %p1307_p8 }
  0x58   : > { %1317 = shalt.err (!%p1314_p13)
}
  0x59   : > { %1164 = dma.hbm_to_vmem [thread:$0]  (!%p1636_p0), %s1693_s11, 256, %s1697_s15, %s391_s17  }
  0x5a   : > { %s2015_s9 = sshll.u32 %s1630_s29, 4  ;;  %s1318_s21 = scalar_lea.hbm %s1702_s18, 256 }
  0x5b   : > { %s436_s10 = scalar_lea.vmem [#allocation7], %s2015_s9  ;;  %p1319_p11 = scmp.ne.s32.totalorder %s1702_s18, %s1318_s21 }
  0x5c   : > { %s446_s27 = sshll.u32 %s436_s10, 4  ;;  %s1323_s6 = scalar_lea.hbm %s1975_s7, 512  ;;  %s447_s27 = int_to_ptr.vmem [resolvable:$true] %s446_s27 }
  0x5d   : > { %p1321_p2 = pnand %p1319_p11, %p1656_p4  ;;  %p1324_p5 = scmp.lt.u32.totalorder %s1702_s18, %s1975_s7 }
  0x5e   : > { %p1325_p7 = scmp.lt.u32.totalorder %s1323_s6, %s1318_s21  ;;  %p1327_p12 = scmp.lt.u32.totalorder %s1318_s21, %s1702_s18 }
  0x5f   : > { %p1322_p3 = pneg %p1321_p2 }
  0x60   : > { %p1326_p10 = por %p1325_p7, %p1324_p5 }
  0x62   : > { %p1328_p1 = por %p1327_p12, %p1326_p10 }
  0x64   : > { %p1329_p8 = pnand %p1328_p1, %p1322_p3 }
  0x66   : > { %1332 = shalt.err (!%p1329_p8)
}
  0x67   : > { %s1333_s17 = scalar_lea.vmem %s447_s27, 256  ;;  %s1498_s29 = smov [#allocation7]  }
  0x68   : > { %p1334_p9 = scmp.ne.s32.totalorder %s447_s27, %s1333_s17  ;;  %s1338_s11 = sshll.u32 %s1498_s29, 4  ;;  %s1339_s11 = int_to_ptr.vmem [resolvable:$false] %s1338_s11 }
  0x69   : > { %s1340_s15 = scalar_lea.vmem %s1339_s11, 512  ;;  %p1341_p11 = scmp.lt.s32.totalorder %s447_s27, %s1339_s11 }
  0x6a   : > { %p1336_p6 = pnand %p1334_p9, %p1656_p4  ;;  %p1342_p2 = scmp.lt.s32.totalorder %s1340_s15, %s1333_s17 }
  0x6c   : > { %p1337_p13 = pneg %p1336_p6  ;;  %p1343_p0 = por %p1342_p2, %p1341_p11 }
  0x6e   : > { %p1344_p5 = pnand %p1343_p0, %p1337_p13 }
  0x70   : > { %1347 = shalt.err (!%p1344_p5)
}
  0x71   : > { %p2016_p7 = scmp.ne.s32.totalorder %s2009_s12, 0  ;;  %p2017_p3 = scmp.ne.s32.totalorder %s2014_s28, 0 }
  0x72   : > { %s1749_s13 = sand.u32 (!%p2017_p3), 1, %s1478_s14   ;;  %p2018_p0 = scmp.ne.s32.totalorder (!%p2017_p3), %s2004_s25, 0 }
  0x73   : > { %1170 = dma.hbm_to_vmem [thread:$0]  (!%p2016_p7), %s1702_s18, 256, %s447_s27, %s1650_s23  }
  0x74   : > { %455 = sbr.rel (%p2017_p3) target bundleno = 454 (0x1c6), region = 52  ;;  %s1752_s8 = sshll.u32 (!%p2017_p3), %s1749_s13, 4 }
  0x75   : > { %s458_s9 = scalar_lea.sflag (!%p2017_p3), [#allocation3], %s1749_s13  ;;  %s461_s10 = scalar_lea.vmem (!%p2017_p3), [#allocation2], %s1752_s8 }
  0x7b   : > { %1457 = dma.done.wait (%p2018_p0), %s458_s9, 256  }
  0x7c   : > { %1459 = vsyncadd (%p2018_p0), %s458_s9, 4294967040  ;;  %s466_s18 = sand.u32 1, %s1590_s19   ;;  %s1104_s12 = sshll.u32 %s1749_s13, 3 }
  0x7d   : > { %s467_s23 = scalar_lea.sflag [#allocation6], %s466_s18  ;;  %s1766_s28 = scalar_lea.vmem [#allocation5], %s1104_s12 }
  0x7e   : > { %1461 = dma.done.wait (%p2018_p0), %s467_s23, 384  }
  0x7f   : > { %1463 = vsyncadd (%p2018_p0), %s467_s23, 4294966912  ;;  %p568_p4 = scmp.lt.s32.totalorder %s1486_s16, 1  ;;  %v1499_v0 = vmov 0   ;;  %v601_v9 = vld [vmem:[%s1969_s1] sm:$0xff]  ;;  %s479_s29 = scalar_lea.vmem [#allocation7], %s1752_s8  ;;  %v731_v28 = vld [vmem:[%s1971_s3 + $0x8] sm:$0xff] }
  0x80   : > { %719 = vmatprep.mubr.bf16.mxu0 %v1499_v0  ;;  %1233 = vset.pattern.permute.xlu0 %v1499_v0  ;;  %v584_v18 = vld [vmem:[%s1968_s0] sm:$0xf]  ;;  %v736_v24 = vld [vmem:[%s479_s29 + $0x8] sm:$0xff]  ;;  %v738_v43 = vld [vmem:[%s461_s10 + $0x8] sm:$0xff]  ;;  %s2019_s17 = sld [smem:[#allocation24_spill]]  ;;  %s1842_s15 = scalar_lea.vmem [#allocation9], %s1104_s12 }
  0x81   : > { %s569_s27 = scalar_select %p568_p4, %s1486_s16, 1  ;;  %604 = vperm.xlu0 %1233, %v601_v9   ;;  %v732_v19 = vld [vmem:[%s1766_s28] sm:$0xff]  ;;  %v735_v21 = vld [vmem:[%s479_s29] sm:$0xff] }
  0x82   : > { %v733_v20 = vunpack.c.l.bf16 %v732_v19  ;;  %v734_v22 = vunpack.c.h.bf16 %v732_v19  ;;  %v730_v25 = vld [vmem:[%s1971_s3] sm:$0xff]  ;;  %s1813_s28 = scalar_lea.vmem [#allocation11], %s1752_s8  ;;  %v729_v48 = vld [vmem:[%s1970_s2 + $0x8] sm:$0xff]  ;;  %s823_s9 = sshll.u32 %s1842_s15, 4  ;;  %s1883_s9 = int_to_ptr.vmem [resolvable:$true] %s823_s9 }
  0x83   : > { %s1144_s21 = sshll.u32 %s569_s27, 7  ;;  %v737_v40 = vld [vmem:[%s461_s10] sm:$0xff]  ;;  %s1146_s10 = sshll.u32 %s1486_s16, 8 }
  0x84   : > { %s1777_s6 = scalar_lea.vmem %s1972_s4, %s1144_s21  ;;  %v739_v23 = vsub.f32 %v735_v21, %v733_v20  ;;  %v740_v26 = vsub.f32 %v736_v24, %v734_v22  ;;  %v728_v44 = vld [vmem:[%s1970_s2] sm:$0xff]  ;;  %s781_s23 = scalar_lea.sflag [#allocation4], %s1749_s13 }
  0x85   : > { %v1234_v1 = vld [vmem:[%s1777_s6 + $0x4] ss:$8 sps:$4 sm:$0xff]   ;;  %v1236_v2 = vld [vmem:[%s1777_s6] ss:$8 sps:$4 sm:$0xff]   ;;  %v1237_v3 = vld [vmem:[%s1777_s6 + $0x14] ss:$8 sps:$4 sm:$0xff]  }
  0x86   : > { %687 = vmatprep.subr.bf16.mxu0 %v1234_v1  ;;  %v1239_v4 = vld [vmem:[%s1777_s6 + $0x10] ss:$8 sps:$4 sm:$0xff]   ;;  %v1240_v5 = vld [vmem:[%s1777_s6 + $0x24] ss:$8 sps:$4 sm:$0xff]   ;;  %v1242_v6 = vld [vmem:[%s1777_s6 + $0x20] ss:$8 sps:$4 sm:$0xff]   ;;  %v741_v27 = vmul.f32 %v739_v23, %v730_v25  ;;  %v742_v29 = vmul.f32 %v740_v26, %v731_v28  ;;  %s2020_s29 = smov %s2019_s17  ;;  %s1834_s11 = scalar_lea.hbm %s2019_s17, %s1146_s10 }
  0x87   : > { %688 = vmatpush1.bf16.msra.mxu0 %v1236_v2  ;;  %v1243_v7 = vld [vmem:[%s1777_s6 + $0x34] ss:$8 sps:$4 sm:$0xff]   ;;  %v1245_v8 = vld [vmem:[%s1777_s6 + $0x30] ss:$8 sps:$4 sm:$0xff]   ;;  %v1246_v10 = vld [vmem:[%s1777_s6 + $0x44] ss:$8 sps:$4 sm:$0xff]  }
  0x88   : > { %689 = vmatprep.subr.bf16.mxu0 %v1237_v3  ;;  %v1248_v11 = vld [vmem:[%s1777_s6 + $0x40] ss:$8 sps:$4 sm:$0xff]   ;;  %v1249_v12 = vld [vmem:[%s1777_s6 + $0x54] ss:$8 sps:$4 sm:$0xff]   ;;  %v1251_v13 = vld [vmem:[%s1777_s6 + $0x50] ss:$8 sps:$4 sm:$0xff]   ;;  %v743_v30 = vadd.f32 %v741_v27, %v733_v20  ;;  %v744_v31 = vadd.f32 %v742_v29, %v734_v22 }
  0x89   : > { %v1252_v14 = vld [vmem:[%s1777_s6 + $0x64] ss:$8 sps:$4 sm:$0xff]   ;;  %v1254_v15 = vld [vmem:[%s1777_s6 + $0x60] ss:$8 sps:$4 sm:$0xff]   ;;  %v1255_v16 = vld [vmem:[%s1777_s6 + $0x74] ss:$8 sps:$4 sm:$0xff]  }
  0x8a   : > { %v1257_v17 = vld [vmem:[%s1777_s6 + $0x70] ss:$8 sps:$4 sm:$0xff]   ;;  %v745_v32 = vmul.f32 1.8, %v743_v30  ;;  %v746_v33 = vmul.f32 1.8, %v744_v31  ;;  %778 = vst [vmem:[%s1813_s28] sm:$0xff] %v743_v30 }
  0x8b   : > { %690 = vmatpush1.bf16.msra.mxu0 %v1239_v4  ;;  %779 = vst [vmem:[%s1813_s28 + $0x8] sm:$0xff] %v744_v31  ;;  %s540_s6 = scalar_lea.vmem [#allocation8], %s1752_s8  ;;  %s1147_s8 = sshll.u32 %s1486_s16, 7 }
  0x8c   : > { %691 = vmatprep.subr.bf16.mxu0 %v1240_v5  ;;  %v747_v34 = vadd.f32 1.6, %v745_v32  ;;  %v1809_v35 = vadd.f32 1.6, %v746_v33  ;;  %s807_s25 = sshll.u32 %s540_s6, 4  ;;  %p2023_p12 = scmp.ne.s32.totalorder %s2005_s26, 0  ;;  %s1836_s25 = int_to_ptr.vmem [resolvable:$true] %s807_s25 }
  0x8d   : > { %s1348_s27 = scalar_lea.vmem %s1836_s25, 256  ;;  %s1500_s21 = smov [#allocation8]  }
  0x8e   : > { %v755_v36 = vmul.f32 %v747_v34, %v733_v20  ;;  %v756_v37 = vmul.f32 %v1809_v35, %v734_v22  ;;  %p1349_p10 = scmp.ne.s32.totalorder %s1836_s25, %s1348_s27  ;;  %s1352_s30 = sshll.u32 %s1500_s21, 4  ;;  %s1353_s30 = int_to_ptr.vmem [resolvable:$false] %s1352_s30 }
  0x8f   : > { %692 = vmatpush1.bf16.msra.mxu0 %v1242_v6  ;;  %s1354_s20 = scalar_lea.vmem %s1353_s30, 512  ;;  %p1355_p9 = scmp.lt.s32.totalorder %s1836_s25, %s1353_s30 }
  0x90   : > { %693 = vmatprep.subr.bf16.mxu0 %v1243_v7  ;;  %p1350_p1 = pnand %p1349_p10, %p2023_p12  ;;  %p1356_p6 = scmp.lt.s32.totalorder %s1354_s20, %s1348_s27 }
  0x92   : > { %p1351_p8 = pneg %p1350_p1  ;;  %p1357_p13 = por %p1356_p6, %p1355_p9 }
  0x93   : > { %694 = vmatpush1.bf16.msra.mxu0 %v1245_v8 }
  0x94   : > { %695 = vmatprep.subr.bf16.mxu0 %v1246_v10  ;;  %p1358_p11 = pnand %p1357_p13, %p1351_p8 }
  0x97   : > { %696 = vmatpush1.bf16.msra.mxu0 %v1248_v11 }
  0x98   : > { %697 = vmatprep.subr.bf16.mxu0 %v1249_v12 }
  0x9b   : > { %698 = vmatpush1.bf16.msra.mxu0 %v1251_v13 }
  0x9c   : > { %699 = vmatprep.subr.bf16.mxu0 %v1252_v14 }
  0x9f   : > { %700 = vmatpush1.bf16.msra.mxu0 %v1254_v15 }
  0xa0   : > { %701 = vmatprep.subr.bf16.mxu0 %v1255_v16 }
  0xa3   : > { %702 = vmatpush1.bf16.msra.mxu0 %v1257_v17 }
  0xa6   : > { %720 = vmatmul.mubr.bf16.vlgmr.msra.gmra.mrb[0].mxu0 %v584_v18 }
 0x100   : > { %v605_v38 = vpop.permute.xlu0 %604 }
 0x179   : > { %v721_v39 = vpop.f32.mrb[0].mxu0 }
 0x17a   : > { %v722_v41 = vadd.f32 %v721_v39, %v605_v38  ;;  %v723_v42 = vpop.f32.mrb[1].mxu0 }
 0x17b   : > { %v724_v45 = vadd.f32 %v723_v42, %v605_v38  ;;  %v725_v46 = vpop.f32.mrb[2].mxu0 }
 0x17c   : > { %v749_v47 = vsub.f32 %v737_v40, %v722_v41  ;;  %v726_v49 = vpop.f32.mrb[3].mxu0 }
 0x17d   : > { %v750_v50 = vsub.f32 %v738_v43, %v724_v45 }
 0x17e   : > { %v751_v51 = vmul.f32 %v749_v47, %v728_v44 }
 0x17f   : > { %v752_v52 = vmul.f32 %v750_v50, %v729_v48 }
 0x180   : > { %v753_v53 = vadd.f32 %v751_v51, %v722_v41 }
 0x181   : > { %v754_v54 = vadd.f32 %v752_v52, %v724_v45 }
 0x182   : > { %v757_v55 = vsub.f32 %v753_v53, %v755_v36 }
 0x183   : > { %v758_v56 = vsub.f32 %v754_v54, %v756_v37 }
 0x184   : > { %v759_v57 = vsub.f32 %v757_v55, %v747_v34  ;;  %763 = vst [vmem:[%s540_s6] sm:$0xff] %v757_v55 }
 0x185   : > { %v760_v58 = vsub.f32 %v758_v56, %v1809_v35  ;;  %764 = vst [vmem:[%s540_s6 + $0x8] sm:$0xff] %v758_v56 }
 0x186   : > { %vm1845_vm0 = vcmp.gt.f32.partialorder %v759_v57, 0.0 }
 0x187   : > { %1361 = shalt.err (!%p1358_p11)
}
 0x188   : > { %s1362_s13 = scalar_lea.hbm %s1834_s11, 256  ;;  %s1366_s22 = scalar_lea.hbm %s2020_s29, 512 }
 0x189   : > { %p1363_p2 = scmp.ne.s32.totalorder %s1834_s11, %s1362_s13  ;;  %p1367_p3 = scmp.lt.u32.totalorder %s1834_s11, %s2020_s29 }
 0x18a   : > { %p1368_p0 = scmp.lt.u32.totalorder %s1366_s22, %s1362_s13  ;;  %p1370_p10 = scmp.lt.u32.totalorder %s1362_s13, %s1834_s11 }
 0x18b   : > { %p1364_p5 = pnand %p1363_p2, %p2023_p12 }
 0x18c   : > { %p1369_p4 = por %p1368_p0, %p1367_p3 }
 0x18d   : > { %p1365_p7 = pneg %p1364_p5 }
 0x18e   : > { %p1371_p1 = por %p1370_p10, %p1369_p4 }
 0x190   : > { %p1372_p8 = pnand %p1371_p1, %p1365_p7 }
 0x192   : > { %1375 = shalt.err (!%p1372_p8)
}
 0x193   : > { %1155 = dma.vmem_to_hbm [thread:$0]  (%p2023_p12), %s1836_s25, 256, %s1834_s11, %s781_s23   ;;  %v1501_v60 = vmov 0.0   ;;  %vm762_vm1 = vcmp.gt.f32.partialorder %v760_v58, 0.0 }
 0x194   : > { %v1127_v61 = vsel %vm1845_vm0, 1.0, %v1501_v60  ;;  %s839_s27 = sshll.u32 %s1813_s28, 4  ;;  %v1128_v62 = vsel %vm762_vm1, 1.0, %v1501_v60  ;;  %s2024_s20 = sld [smem:[#allocation25_spill]]  ;;  %s1892_s27 = int_to_ptr.vmem [resolvable:$true] %s839_s27 }
 0x195   : > { %v1145_v63 = vpack.c.bf16 %v1128_v62, %v1127_v61  ;;  %s2025_s11 = sld [smem:[#allocation26_spill]]  ;;  %s1897_s28 = scalar_lea.sflag [#allocation10], %s466_s18 }
 0x196   : > { %s1502_s16 = smov [#allocation9]  }
 0x197   : > { %777 = vst [vmem:[%s1842_s15] sm:$0xff] %v1145_v63  ;;  %s1380_s6 = sshll.u32 %s1502_s16, 4  ;;  %s1381_s6 = int_to_ptr.vmem [resolvable:$false] %s1380_s6 }
 0x198   : > { %s1382_s22 = scalar_lea.vmem %s1381_s6, 256  ;;  %p1383_p11 = scmp.lt.s32.totalorder %s1883_s9, %s1381_s6 }
 0x19a   : > { %s1879_s13 = scalar_lea.hbm %s2024_s20, %s1147_s8  ;;  %s1376_s8 = scalar_lea.vmem %s1883_s9, 128 }
 0x19b   : > { %s1890_s23 = scalar_lea.hbm %s2025_s11, %s1146_s10  ;;  %p1377_p9 = scmp.ne.s32.totalorder %s1883_s9, %s1376_s8 }
 0x19c   : > { %p1384_p2 = scmp.lt.s32.totalorder %s1382_s22, %s1376_s8 }
 0x19d   : > { %p1378_p6 = pnand %p1377_p9, %p2023_p12 }
 0x19e   : > { %p1385_p5 = por %p1384_p2, %p1383_p11 }
 0x19f   : > { %p1379_p13 = pneg %p1378_p6 }
 0x1a1   : > { %p1386_p7 = pnand %p1385_p5, %p1379_p13 }
 0x1a3   : > { %1389 = shalt.err (!%p1386_p7)
}
 0x1a4   : > { %s1390_s19 = scalar_lea.hbm %s1879_s13, 128  ;;  %s1394_s15 = scalar_lea.hbm %s2024_s20, 256 }
 0x1a5   : > { %p1391_p3 = scmp.ne.s32.totalorder %s1879_s13, %s1390_s19  ;;  %p1395_p10 = scmp.lt.u32.totalorder %s1879_s13, %s2024_s20 }
 0x1a6   : > { %p1396_p1 = scmp.lt.u32.totalorder %s1394_s15, %s1390_s19  ;;  %p1398_p9 = scmp.lt.u32.totalorder %s1390_s19, %s1879_s13 }
 0x1a7   : > { %p1392_p0 = pnand %p1391_p3, %p2023_p12 }
 0x1a8   : > { %p1397_p8 = por %p1396_p1, %p1395_p10 }
 0x1a9   : > { %p1393_p4 = pneg %p1392_p0 }
 0x1aa   : > { %p1399_p6 = por %p1398_p9, %p1397_p8 }
 0x1ac   : > { %p1400_p13 = pnand %p1399_p6, %p1393_p4 }
 0x1ae   : > { %1403 = shalt.err (!%p1400_p13)
}
 0x1af   : > { %1156 = dma.vmem_to_hbm [thread:$0]  (%p2023_p12), %s1883_s9, 128, %s1879_s13, %s1897_s28  }
 0x1b0   : > { %s1404_s21 = scalar_lea.vmem %s1892_s27, 256  ;;  %s1503_s30 = smov [#allocation11]  }
 0x1b1   : > { %p1405_p11 = scmp.ne.s32.totalorder %s1892_s27, %s1404_s21  ;;  %s1408_s12 = sshll.u32 %s1503_s30, 4  ;;  %s1409_s12 = int_to_ptr.vmem [resolvable:$false] %s1408_s12 }
 0x1b2   : > { %s1410_s25 = scalar_lea.vmem %s1409_s12, 512  ;;  %p1411_p7 = scmp.lt.s32.totalorder %s1892_s27, %s1409_s12 }
 0x1b3   : > { %p1406_p2 = pnand %p1405_p11, %p2023_p12  ;;  %p1412_p3 = scmp.lt.s32.totalorder %s1410_s25, %s1404_s21 }
 0x1b5   : > { %p1407_p5 = pneg %p1406_p2  ;;  %p1413_p0 = por %p1412_p3, %p1411_p7 }
 0x1b7   : > { %p1414_p4 = pnand %p1413_p0, %p1407_p5 }
 0x1b9   : > { %1417 = shalt.err (!%p1414_p4)
}
 0x1ba   : > { %s1418_s9 = scalar_lea.hbm %s1890_s23, 256  ;;  %s1422_s16 = scalar_lea.hbm %s2025_s11, 512 }
 0x1bb   : > { %p1419_p10 = scmp.ne.s32.totalorder %s1890_s23, %s1418_s9  ;;  %p1423_p9 = scmp.lt.u32.totalorder %s1890_s23, %s2025_s11 }
 0x1bc   : > { %p1424_p6 = scmp.lt.u32.totalorder %s1422_s16, %s1418_s9  ;;  %p1426_p11 = scmp.lt.u32.totalorder %s1418_s9, %s1890_s23 }
 0x1bd   : > { %p1420_p1 = pnand %p1419_p10, %p2023_p12 }
 0x1be   : > { %p1425_p13 = por %p1424_p6, %p1423_p9 }
 0x1bf   : > { %p1421_p8 = pneg %p1420_p1 }
 0x1c0   : > { %p1427_p2 = por %p1426_p11, %p1425_p13 }
 0x1c2   : > { %p1428_p5 = pnand %p1427_p2, %p1421_p8 }
 0x1c4   : > { %1431 = shalt.err (!%p1428_p5)
}
 0x1c5   : > { %1157 = dma.vmem_to_hbm [thread:$0]  (%p2023_p12), %s1892_s27, 256, %s1890_s23, %s1897_s28  }
 0x1c6 PF: > { %s2026_s19 = sld [smem:[#allocation16_spill]]  ;;  %s2027_s18 = sld [smem:[#allocation22_spill]] }
 0x1c7   : > { %s2028_s10 = sld [smem:[#allocation19_spill]] }
 0x1cc   : > { %s851_s15 = sand.u32 1, %s2026_s19   ;;  %p2029_p7 = scmp.ne.s32.totalorder %s2027_s18, 0 }
 0x1cd   : > { %p2030_p3 = scmp.ge.s32.totalorder %s2028_s10, 2  ;;  %s852_s24 = scalar_lea.sflag [#allocation4], %s851_s15 }
 0x1cf   : > { %p1172_p0 = pnand %p2030_p3, %p2029_p7 }
 0x1d1   : > { %1465 = dma.done.wait (!%p1172_p0), %s852_s24, 256  }
 0x1d2   : > { %1467 = vsyncadd (!%p1172_p0), %s852_s24, 4294967040  ;;  %s2031_s17 = sadd.s32 4294967294, %s2028_s10  }
 0x1d3   : > { %s860_s21 = sand.u32 1, %s2031_s17  }
 0x1d4   : > { %s861_s30 = scalar_lea.sflag [#allocation10], %s860_s21 }
 0x1d5   : > { %1469 = dma.done.wait (!%p1172_p0), %s861_s30, 384  }
 0x1d6   : > { %1471 = vsyncadd (!%p1172_p0), %s861_s30, 4294966912  ;;  %s33_s18 = sadd.s32 1, %s2028_s10   ;;  %s2032_s26 = sld [smem:[#allocation17_spill]] }
 0x1d7   : > { %p30_p12 = scmp.ge.s32.totalorder %s33_s18, 4   ;;  %s2033_s15 = sld [smem:[#allocation21_spill]] }
 0x1d8   : > { %s2034_s16 = sld [smem:[#allocation18_spill]]  ;;  %s2035_s17 = sld [smem:[#allocation20_spill]] }
 0x1d9   : > { %s2036_s13 = smov %s1478_s14  ;;  %32 = sbr.rel (!%p30_p12) target bundleno = 15 (0xf), region = 162 }
 0x1dc   : > { %s2037_s14 = smov %s2032_s26 }
 0x1e0   :  { %875 = vsyncpa [#allocation3], 1 }
 0x1e1   :  { %877 = vsyncpa [#allocation3 + $0x1], 1 }
 0x1e2   :  { %878 = vsyncpa [#allocation6], 1 }
 0x1e3   :  { %880 = vsyncpa [#allocation6 + $0x1], 1 }
 0x1e4   :  { %881 = vsyncpa [#allocation4], 1 }
 0x1e5   :  { %883 = vsyncpa [#allocation4 + $0x1], 1 }
 0x1e6   :  { %884 = vsyncpa [#allocation10], 1 }
 0x1e7   :  { %886 = vsyncpa [#allocation10 + $0x1], 1 }

</bundles_post_ra>
